<compile_context>
chip_gen: v6e
topology: v6e:2x2x1
jax: 0.10.0
libtpu: 0.0.40
codegen_flags: <defaults>
</compile_context>

<pallas_src>
import functools
import math

import jax
import jax.numpy as jnp
from jax.experimental import pallas as pl
from jax.experimental.pallas import tpu as pltpu

_MIB = 1024 * 1024


def _round_up(x, m):
    return ((x + m - 1) // m) * m


def _sublane(dtype):
    # dtype-dependent sublane packing multiple: f32 -> 8, bf16 -> 16, 8-bit -> 32
    return {4: 8, 2: 16, 1: 32}.get(jnp.dtype(dtype).itemsize, 8)


def _tpu_vmem_capacity():
    try:
        return int(pltpu.get_tpu_info().vmem_capacity_bytes)
    except Exception:
        return 64 * _MIB  # conservative fallback (v7x per-TensorCore VMEM)


def _silu_f32(z):
    """SiLU(z) = z * sigmoid(z), with the reciprocal pushed onto the EUP.

    exp and the approximate reciprocal both use the (otherwise idle) EUP slot
    in the epilogue; two Newton steps restore ~f32 accuracy, and the clamp
    keeps exp(-z) finite for very negative z.
    """
    e = jnp.exp(-jnp.maximum(z, -30.0))
    d = 1.0 + e
    r = pl.reciprocal(d, approx=True)
    r = r * (2.0 - d * r)
    r = r * (2.0 - d * r)
    return z * r


def _residual_block_kernel(x_ref, w_ref, b_ref, *rest, skip, acc_in_out):
    """One (tm, tn) output tile, reduced over the K grid axis.

    x_ref    : (tm, tk)  activation tile (native dtype -> straight to the MXU)
    w_ref    : (tk, tn)  pre-transposed weight tile
    b_ref    : (1, tn)   bias tile
    [xres_ref: (tm, tn)] residual window of x (only when skip is active)
    o_ref    : (tm, tn)  output tile (resident across K)
    [acc_ref : (tm, tn)] f32 scratch (only when the output dtype is not f32)
    """
    if skip:
        if acc_in_out:
            xres_ref, o_ref = rest
            acc_ref = o_ref
        else:
            xres_ref, o_ref, acc_ref = rest
    else:
        xres_ref = None
        if acc_in_out:
            (o_ref,) = rest
            acc_ref = o_ref
        else:
            o_ref, acc_ref = rest

    k = pl.program_id(2)

    @pl.when(k == 0)
    def _():
        acc_ref[...] = jnp.zeros_like(acc_ref)

    # Native-dtype operands into the MXU; accumulate in f32.
    acc_ref[...] += jnp.dot(x_ref[...], w_ref[...],
                            preferred_element_type=jnp.float32)

    @pl.when(k == pl.num_programs(2) - 1)
    def _():
        z = acc_ref[...] + b_ref[...].astype(jnp.float32)
        out = _silu_f32(z)
        if skip:
            out = out + xres_ref[...].astype(jnp.float32)
        o_ref[...] = out.astype(o_ref.dtype)


def _plan_tiles(B, K, N, x_dtype, w_dtype, out_dtype, skip):
    """Pick (tm, tn, tk) and padded dims, generation- and VMEM-aware."""
    x_item = jnp.dtype(x_dtype).itemsize
    w_item = jnp.dtype(w_dtype).itemsize
    o_item = jnp.dtype(out_dtype).itemsize
    sub = _sublane(x_dtype)

    vmem_cap = _tpu_vmem_capacity()
    if vmem_cap <= 80 * _MIB:           # v7x-class: 64 MiB per TensorCore
        budget = 44 * _MIB
        tm_cap, tn_cap, tk_cap = 512, 512, 1024
    else:                               # v5e / v6e: 128 MiB
        budget = 96 * _MIB
        tm_cap, tn_cap, tk_cap = 1024, 512, 2048

    Np = _round_up(N, 128)
    Kp = _round_up(K, 128)

    # Tile sizes must divide the 128-rounded dims exactly, so 128-aligned
    # layers never pay a per-call jnp.pad of the weight.
    tn_opts = [c for c in (512, 384, 256, 128) if c <= tn_cap and Np % c == 0]
    tk_opts = [c for c in (2048, 1536, 1024, 768, 512, 384, 256, 128)
               if c <= tk_cap and Kp % c == 0]
    tn = tn_opts[0]
    tk = tk_opts[0]
    tm = min(tm_cap, _round_up(B, sub))

    acc_in_out = jnp.dtype(out_dtype) == jnp.dtype(jnp.float32)

    def footprint(tm_, tn_, tk_):
        f = (2 * tm_ * tk_ * x_item        # x tiles (double buffered)
             + 2 * tk_ * tn_ * w_item      # W^T tiles
             + 2 * tn_ * 4                 # bias tiles (negligible)
             + 2 * tm_ * tn_ * o_item)     # output tiles
        if skip:
            f += 2 * tm_ * tn_ * x_item    # residual window of x
        if not acc_in_out:
            f += tm_ * tn_ * 4             # f32 accumulator scratch
        return f

    # Shrink K, then M, then N until the plan fits the per-generation budget.
    while footprint(tm, tn, tk) > budget and tk != tk_opts[-1]:
        tk = tk_opts[tk_opts.index(tk) + 1]
    while footprint(tm, tn, tk) > budget and tm > sub:
        tm = max(sub, (tm // 2 // sub) * sub)
    while footprint(tm, tn, tk) > budget and tn != tn_opts[-1]:
        tn = tn_opts[tn_opts.index(tn) + 1]

    Mp = _round_up(B, tm)

    # Megacore: v7x has 2 TensorCores; guarantee >= 2 blocks along a parallel
    # grid axis whenever the shape allows (harmless on v5e/v6e).
    if (Mp // tm) * (Np // tn) == 1:
        half_n = [c for c in tn_opts if c <= Np // 2]
        if half_n:
            tn = half_n[0]
        elif B > sub:
            tm = _round_up((B + 1) // 2, sub)
            Mp = _round_up(B, tm)

    return tm, tn, tk, Mp, Np, Kp, acc_in_out, budget


def residual_block(x, w_t, b, *, skip=True):
    """Pallas forward of ResidualBlock: SiLU(x @ W^T + b) [+ x].

    x   : (B, in_size)
    w_t : (in_size, out_size)   (transposed nn.Linear weight)
    b   : (out_size,)
    """
    B, K = x.shape
    Kw, N = w_t.shape
    assert Kw == K, "weight must be stored transposed: (in_size, out_size)"
    skip = skip and (K == N)
    out_dtype = x.dtype

    tm, tn, tk, Mp, Np, Kp, acc_in_out, budget = _plan_tiles(
        B, K, N, x.dtype, w_t.dtype, out_dtype, skip)

    # Pad only when the layer is not already tile-aligned (per-call padding of
    # the weight costs a full extra HBM read+write of W).
    xp = x if (Mp == B and Kp == K) else jnp.pad(x, ((0, Mp - B), (0, Kp - K)))
    wp = w_t if (Kp == K and Np == N) else jnp.pad(w_t, ((0, Kp - K), (0, Np - N)))
    bp = (b if Np == N else jnp.pad(b, (0, Np - N))).reshape(1, Np)

    grid = (Mp // tm, Np // tn, Kp // tk)

    in_specs = [
        pl.BlockSpec((tm, tk), lambda i, j, k: (i, k)),   # x tile (matmul)
        pl.BlockSpec((tk, tn), lambda i, j, k: (k, j)),   # W^T tile
        pl.BlockSpec((1, tn), lambda i, j, k: (0, j)),    # bias tile
    ]
    args = [xp, wp, bp]
    if skip:
        # Residual reads the SAME padded activation buffer through its own
        # (i, j)-aligned window (Kp == Np when skip is active), so no second
        # padded copy of x is materialized.
        in_specs.append(pl.BlockSpec((tm, tn), lambda i, j, k: (i, j)))
        args.append(xp)
    # TODO(synk): for tiny-batch v7x cases, pipeline_mode=pl.Buffered(3) on the
    # weight spec can hide DMA issue latency; omitted here for portability.

    scratch = [] if acc_in_out else [pltpu.VMEM((tm, tn), jnp.float32)]

    x_item = jnp.dtype(x.dtype).itemsize
    w_item = jnp.dtype(w_t.dtype).itemsize
    o_item = jnp.dtype(out_dtype).itemsize
    cost = pl.CostEstimate(
        flops=2 * B * K * N,
        transcendentals=B * N,                                  # sigmoid exp
        bytes_accessed=(x.size * x_item + w_t.size * w_item
                        + b.size * jnp.dtype(b.dtype).itemsize
                        + B * N * o_item
                        + (x.size * x_item if skip else 0)),
    )

    kernel = functools.partial(_residual_block_kernel,
                               skip=skip, acc_in_out=acc_in_out)

    out_padded = pl.pallas_call(
        kernel,
        out_shape=jax.ShapeDtypeStruct((Mp, Np), out_dtype),
        grid_spec=pltpu.PrefetchScalarGridSpec(
            num_scalar_prefetch=0,
            grid=grid,
            in_specs=in_specs,
            out_specs=pl.BlockSpec((tm, tn), lambda i, j, k: (i, j)),
            scratch_shapes=scratch,
        ),
        compiler_params=pltpu.CompilerParams(
            # M and N are independent (megacore-shardable); K is the reduction.
            dimension_semantics=("parallel", "parallel", "arbitrary"),
            vmem_limit_bytes=budget,
        ),
        cost_estimate=cost,
    )(*args)

    if Mp != B or Np != N:
        out_padded = out_padded[:B, :N]
    return out_padded


def init_linear_params(key, in_size, out_size, dtype=jnp.float32):
    """Deterministic init matching nn.Linear defaults (kaiming-uniform-ish).
    PyTorch stores weight as (out, in); we keep the transpose (in, out)."""
    kw, kb = jax.random.split(key)
    bound = 1.0 / math.sqrt(in_size)
    w_t = jax.random.uniform(kw, (in_size, out_size), dtype, -bound, bound)
    b = jax.random.uniform(kb, (out_size,), dtype, -bound, bound)
    return w_t, b


def residual_block_ref(x, w_t, b, skip=True):
    z = x @ w_t + b
    out = z * jax.nn.sigmoid(z)
    if skip and x.shape[-1] == w_t.shape[1]:
        out = out + x
    return out


if __name__ == "__main__":
    key = jax.random.PRNGKey(0)
    k_x, k_p1, k_p2, k_p3 = jax.random.split(key, 4)

    # Case 1: in_size == out_size, f32 -> skip active, accumulate-in-output path.
    batch, hidden = 16, 32
    x = jax.random.normal(k_x, (batch, hidden), jnp.float32)
    w_t, bias = init_linear_params(k_p1, hidden, hidden, jnp.float32)
    out = jax.block_until_ready(residual_block(x, w_t, bias, skip=True))
    ref = residual_block_ref(x, w_t, bias, skip=True)
    assert out.shape == ref.shape
    assert jnp.allclose(out, ref, atol=1e-5, rtol=1e-5), "mismatch (skip path)"

    # Case 2: in_size != out_size -> skip auto-disabled.
    out_size2 = 64
    w_t2, bias2 = init_linear_params(k_p2, hidden, out_size2, jnp.float32)
    out2 = jax.block_until_ready(residual_block(x, w_t2, bias2, skip=True))
    ref2 = residual_block_ref(x, w_t2, bias2, skip=True)
    assert out2.shape == ref2.shape
    assert jnp.allclose(out2, ref2, atol=1e-5, rtol=1e-5), "mismatch (no-skip)"

    # Case 3: bf16 operands -> f32 scratch-accumulator path.
    xb = x.astype(jnp.bfloat16)
    w_t3, bias3 = init_linear_params(k_p3, hidden, hidden, jnp.bfloat16)
    out3 = jax.block_until_ready(residual_block(xb, w_t3, bias3, skip=True))
    ref3 = residual_block_ref(xb.astype(jnp.float32),
                              w_t3.astype(jnp.float32),
                              bias3.astype(jnp.float32), skip=True)
    assert out3.shape == ref3.shape
    assert jnp.allclose(out3.astype(jnp.float32), ref3, atol=3e-2, rtol=3e-2), \
        "mismatch (bf16 path)"

    print("KERNEL_OK")
</pallas_src>

<mosaic_0001>
module attributes {stable_mosaic.version = 11 : i64} {
  func.func @_residual_block_kernel(%arg0: i32, %arg1: i32, %arg2: i32, %arg3: memref<8x128xf32, #tpu.memory_space<vmem>>, %arg4: memref<128x128xf32, #tpu.memory_space<vmem>>, %arg5: memref<1x128xf32, #tpu.memory_space<vmem>>, %arg6: memref<8x128xf32, #tpu.memory_space<vmem>>, %arg7: memref<8x128xf32, #tpu.memory_space<vmem>>) attributes {dimension_semantics = [#tpu.dimension_semantics<parallel>, #tpu.dimension_semantics<parallel>, #tpu.dimension_semantics<arbitrary>], iteration_bounds = array<i64: 2, 1, 1>, scalar_prefetch = 0 : i64, scratch_operands = 0 : i64, tpu.core_type = #tpu.core_type<tc>, window_params = [{transform_indices = @transform_0, window_bounds = array<i64: 8, 128>}, {transform_indices = @transform_1, window_bounds = array<i64: 128, 128>}, {transform_indices = @transform_2, window_bounds = array<i64: 1, 128>}, {transform_indices = @transform_3, window_bounds = array<i64: 8, 128>}, {transform_indices = @transform_4, window_bounds = array<i64: 8, 128>}]} {
    %c0_i32 = arith.constant 0 : i32
    %0 = arith.cmpi eq, %arg2, %c0_i32 : i32
    %1 = arith.extui %0 : i1 to i32
    %c0_i32_0 = arith.constant 0 : i32
    %2 = arith.cmpi ne, %1, %c0_i32_0 : i32
    scf.if %2 {
      %cst_10 = arith.constant 0.000000e+00 : f32
      %12 = vector.broadcast %cst_10 : f32 to vector<8x128xf32>
      %c0_11 = arith.constant 0 : index
      %c0_12 = arith.constant 0 : index
      %13 = vector.load %arg7[%c0_11, %c0_12] : memref<8x128xf32, #tpu.memory_space<vmem>>, vector<8x128xf32>
      tpu.vector_store %arg7[%c0_11, %c0_12], %12 {strides = array<i32>} : memref<8x128xf32, #tpu.memory_space<vmem>>, vector<8x128xf32>,
    } else {
    }
    %c0 = arith.constant 0 : index
    %c0_1 = arith.constant 0 : index
    %3 = vector.load %arg7[%c0, %c0_1] : memref<8x128xf32, #tpu.memory_space<vmem>>, vector<8x128xf32>
    %c0_2 = arith.constant 0 : index
    %c0_3 = arith.constant 0 : index
    %4 = vector.load %arg3[%c0_2, %c0_3] : memref<8x128xf32, #tpu.memory_space<vmem>>, vector<8x128xf32>
    %c0_4 = arith.constant 0 : index
    %c0_5 = arith.constant 0 : index
    %5 = vector.load %arg4[%c0_4, %c0_5] : memref<128x128xf32, #tpu.memory_space<vmem>>, vector<128x128xf32>
    %cst = arith.constant dense<0.000000e+00> : vector<8x128xf32>
    %6 = tpu.matmul %4, %5, %cst {dimension_numbers = #tpu.dot_dimension_numbers<[1], [0], [0], [1], [0, 0, 1, 1], [], []>} : vector<8x128xf32>, vector<128x128xf32>, vector<8x128xf32> -> vector<8x128xf32>
    %7 = arith.addf %3, %6 : vector<8x128xf32>
    %c0_6 = arith.constant 0 : index
    %c0_7 = arith.constant 0 : index
    %8 = vector.load %arg7[%c0_6, %c0_7] : memref<8x128xf32, #tpu.memory_space<vmem>>, vector<8x128xf32>
    tpu.vector_store %arg7[%c0_6, %c0_7], %7 {strides = array<i32>} : memref<8x128xf32, #tpu.memory_space<vmem>>, vector<8x128xf32>,
    %c0_i32_8 = arith.constant 0 : i32
    %9 = arith.cmpi eq, %arg2, %c0_i32_8 : i32
    %10 = arith.extui %9 : i1 to i32
    %c0_i32_9 = arith.constant 0 : i32
    %11 = arith.cmpi ne, %10, %c0_i32_9 : i32
    scf.if %11 {
      %c0_10 = arith.constant 0 : index
      %c0_11 = arith.constant 0 : index
      %12 = vector.load %arg7[%c0_10, %c0_11] : memref<8x128xf32, #tpu.memory_space<vmem>>, vector<8x128xf32>
      %c0_12 = arith.constant 0 : index
      %c0_13 = arith.constant 0 : index
      %13 = vector.load %arg5[%c0_12, %c0_13] : memref<1x128xf32, #tpu.memory_space<vmem>>, vector<1x128xf32>
      %14 = vector.broadcast %13 : vector<1x128xf32> to vector<8x128xf32>
      %15 = arith.addf %12, %14 : vector<8x128xf32>
      %cst_14 = arith.constant -3.000000e+01 : f32
      %16 = vector.broadcast %cst_14 : f32 to vector<8x128xf32>
      %17 = arith.maximumf %15, %16 : vector<8x128xf32>
      %cst_15 = arith.constant 0.000000e+00 : f32
      %18 = vector.broadcast %cst_15 : f32 to vector<8x128xf32>
      %19 = arith.subf %18, %17 : vector<8x128xf32>
      %20 = math.exp %19 : vector<8x128xf32>
      %cst_16 = arith.constant 1.000000e+00 : f32
      %21 = vector.broadcast %cst_16 : f32 to vector<8x128xf32>
      %22 = arith.addf %21, %20 : vector<8x128xf32>
      %23 = tpu.reciprocal %22 {approx = true} : vector<8x128xf32> -> vector<8x128xf32>
      %24 = arith.mulf %22, %23 : vector<8x128xf32>
      %cst_17 = arith.constant 2.000000e+00 : f32
      %25 = vector.broadcast %cst_17 : f32 to vector<8x128xf32>
      %26 = arith.subf %25, %24 : vector<8x128xf32>
      %27 = arith.mulf %23, %26 : vector<8x128xf32>
      %28 = arith.mulf %22, %27 : vector<8x128xf32>
      %cst_18 = arith.constant 2.000000e+00 : f32
      %29 = vector.broadcast %cst_18 : f32 to vector<8x128xf32>
      %30 = arith.subf %29, %28 : vector<8x128xf32>
      %31 = arith.mulf %27, %30 : vector<8x128xf32>
      %32 = arith.mulf %15, %31 : vector<8x128xf32>
      %c0_19 = arith.constant 0 : index
      %c0_20 = arith.constant 0 : index
      %33 = vector.load %arg6[%c0_19, %c0_20] : memref<8x128xf32, #tpu.memory_space<vmem>>, vector<8x128xf32>
      %34 = arith.addf %32, %33 : vector<8x128xf32>
      %c0_21 = arith.constant 0 : index
      %c0_22 = arith.constant 0 : index
      %35 = vector.load %arg7[%c0_21, %c0_22] : memref<8x128xf32, #tpu.memory_space<vmem>>, vector<8x128xf32>
      tpu.vector_store %arg7[%c0_21, %c0_22], %34 {strides = array<i32>} : memref<8x128xf32, #tpu.memory_space<vmem>>, vector<8x128xf32>,
    } else {
    }
    return
  }
  func.func @transform_0(%arg0: i32, %arg1: i32, %arg2: i32) -> (i32, i32) {
    %c0_i32 = arith.constant 0 : i32
    return %arg0, %arg2 : i32, i32
  }
  func.func @transform_1(%arg0: i32, %arg1: i32, %arg2: i32) -> (i32, i32) {
    %c0_i32 = arith.constant 0 : i32
    return %arg2, %arg1 : i32, i32
  }
  func.func @transform_2(%arg0: i32, %arg1: i32, %arg2: i32) -> (i32, i32) {
    %c0_i32 = arith.constant 0 : i32
    %c0_i32_0 = arith.constant 0 : i32
    return %c0_i32, %arg1 : i32, i32
  }
  func.func @transform_3(%arg0: i32, %arg1: i32, %arg2: i32) -> (i32, i32) {
    %c0_i32 = arith.constant 0 : i32
    return %arg0, %arg1 : i32, i32
  }
  func.func @transform_4(%arg0: i32, %arg1: i32, %arg2: i32) -> (i32, i32) {
    %c0_i32 = arith.constant 0 : i32
    return %arg0, %arg1 : i32, i32
  }
}

</mosaic_0001>

<bundles_post_ra>
// kernel: tpu_custom_call.1
= control target key start
LH: loop header
LB: loop body
LE: loop exit
PB: predicated region body
PF: predicated region fallthrough
CT: control target
= control target key end

     0   :  { %9 = vsyncpa [#allocation3], 0  ;;  %s1154_s0 = inlined_call_operand.hbm [shape: f32[16,128], index: 0, kind: input, shape index: {}]   ;;  %s1155_s1 = inlined_call_operand.hbm [shape: f32[128,128], index: 1, kind: input, shape index: {}]   ;;  %s1156_s2 = inlined_call_operand.vmem [shape: f32[1,128], index: 2, kind: input, shape index: {}]   ;;  %s1157_s3 = inlined_call_operand.hbm [shape: f32[16,128], index: 3, kind: input, shape index: {}]   ;;  %s1158_s4 = inlined_call_operand.hbm [shape: f32[16,128], index: 4, kind: output, shape index: {}]  }
   0x1   :  { %11 = vsyncpa [#allocation3 + $0x1], 0 }
   0x2   :  { %12 = vsyncpa [#allocation6], 0 }
   0x3   :  { %13 = vsyncpa [#allocation4], 0 }
   0x4   :  { %15 = vsyncpa [#allocation4 + $0x1], 0  ;;  %s946_s15 = smov 0   ;;  %s948_s16 = smov 0  }
   0x5   :  { %s950_s17 = smov 0   ;;  %s952_s18 = smov 0  }
   0x6   :  { %s954_s19 = smov 0   ;;  %s956_s20 = smov 0  }
   0x7 LB: > { %s40_s21 = sadd.s32 1, %s907_s19  ;;  %s49_s22 = sadd.s32 1, %s899_s17  ;;  %s911_s20 = sphi %s956_s20, %s21_s20   ;;  %s907_s19 = sphi %s954_s19, %s1178_s19   ;;  %s903_s18 = sphi %s952_s18, %s1177_s18   ;;  %s899_s17 = sphi %s950_s17, %s1176_s17   ;;  %s895_s16 = sphi %s948_s16, %s1175_s16   ;;  %s891_s15 = sphi %s946_s15, %s1174_s15  }
   0x8   : > { %p42_p0 = scmp.ge.s32.totalorder %s40_s21, 2  ;;  %p56_p1 = scmp.ne.s32.totalorder %s899_s17, %s895_s16 }
   0x9   : > { %p57_p2 = scmp.eq.s32.totalorder %s911_s20, 0  ;;  %p681_p5 = scmp.lt.s32.totalorder %s911_s20, 2 }
   0xa   : > { %s1180_s21 = smov (%p42_p0, %s40_s21), 0  ;;  %s219_s24 = sand.u32 1, %s911_s20  }
   0xb   : > { %p58_p4 = por %p57_p2, %p56_p1  ;;  %s44_s23 = ssub.s32 %s907_s19, %s1180_s21 }
   0xc   : > { %p47_p6 = scmp.eq.s32.totalorder %s44_s23, 0  ;;  %s221_s25 = sand.u32 1, %s899_s17  }
   0xd   : > { %s590_s26 = sshll.u32 %s907_s19, 7  ;;  %s996_s28 = sshll.u32 %s221_s25, 3 }
   0xe   : > { %s994_s27 = scalar_select %p47_p6, %s899_s17, %s49_s22  }
   0xf   : > { %s229_s5 = scalar_lea.hbm %s1154_s0, %s590_s26  ;;  %p1003_p7 = pnand %p681_p5, %p58_p4 }
  0x10   : > { %s223_s7 = scalar_lea.vmem [#allocation2], %s996_s28  ;;  %s1008_s9 = scalar_lea.sflag [#allocation3], %s219_s24 }
  0x11   : > { %s231_s8 = sshll.u32 %s223_s7, 4  ;;  %p743_p8 = pneg %p1003_p7  ;;  %s232_s8 = int_to_ptr.vmem [resolvable:$true] %s231_s8 }
  0x12   : > { %s754_s10 = scalar_lea.vmem %s232_s8, 128  ;;  %s913_s11 = smov [#allocation2]  }
  0x13   : > { %p755_p9 = scmp.ne.s32.totalorder %s232_s8, %s754_s10  ;;  %s759_s12 = sshll.u32 %s913_s11, 4  ;;  %s760_s12 = int_to_ptr.vmem [resolvable:$false] %s759_s12 }
  0x14   : > { %s761_s13 = scalar_lea.vmem %s760_s12, 256  ;;  %p762_p12 = scmp.lt.s32.totalorder %s232_s8, %s760_s12 }
  0x15   : > { %p757_p10 = pnand %p755_p9, %p743_p8  ;;  %p763_p13 = scmp.lt.s32.totalorder %s761_s13, %s754_s10 }
  0x17   : > { %p758_p11 = pneg %p757_p10  ;;  %p764_p0 = por %p763_p13, %p762_p12 }
  0x19   : > { %p765_p2 = pnand %p764_p0, %p758_p11 }
  0x1b   : > { %768 = shalt.err (!%p765_p2)
}
  0x1c   : > { %672 = dma.hbm_to_vmem [thread:$0]  (!%p1003_p7), %s229_s5, 128, %s232_s8, %s1008_s9  }
  0x1d   : > { %s1019_s14 = sadd.s32 4294967295, %s911_s20   ;;  %s584_s22 = sadd.s32 4294967294, %s911_s20  }
  0x1e   : > { %p62_p4 = scmp.ne.s32.totalorder %s895_s16, %s891_s15  ;;  %p1160_p5 = scmp.eq.s32.totalorder %s1019_s14, 0 }
  0x1f   : > { %p170_p6 = scmp.eq.s32.totalorder %s1019_s14, 1  ;;  %p176_p9 = scmp.eq.s32.totalorder %s584_s22, 1 }
  0x20   : > { %p585_p10 = scmp.ge.s32.totalorder %s911_s20, 1  ;;  %p1029_p11 = por %p1160_p5, %p62_p4 }
  0x21   : > { %p1036_p12 = por %p170_p6, %p56_p1  ;;  %p1040_p13 = por %p176_p9, %p62_p4 }
  0x22   : > { %s1163_s23 = scalar_select %p1029_p11, 1, 0 }
  0x23   : > { %s1164_s24 = scalar_select %p1036_p12, 1, 0 }
  0x24   : > { %s1165_s25 = scalar_select %p1040_p13, 1, 0 }
  0x25   : > { %p183_p0 = scmp.lt.s32.totalorder %s911_s20, 3  ;;  %s914_s30 = smov [#allocation5]  }
  0x26   : > { %s199_s5 = sshll.u32 %s914_s30, 4  ;;  %s248_s10 = scalar_lea.hbm %s1157_s3, %s590_s26  ;;  %s1054_s5 = int_to_ptr.vmem [resolvable:$true] %s199_s5 }
  0x27   : > { %p1045_p2 = pnand %p585_p10, %p183_p0  ;;  %s242_s11 = scalar_lea.vmem [#allocation7], %s996_s28 }
  0x28   : > { %s250_s12 = sshll.u32 %s242_s11, 4  ;;  %s915_s30 = smov [#allocation7]   ;;  %s251_s12 = int_to_ptr.vmem [resolvable:$true] %s250_s12 }
  0x29   : > { %p665_p1 = pneg %p1045_p2  ;;  %s782_s22 = scalar_lea.vmem %s251_s12, 128 }
  0x2a   : > { %p783_p6 = scmp.ne.s32.totalorder %s251_s12, %s782_s22  ;;  %s787_s26 = sshll.u32 %s915_s30, 4  ;;  %s788_s26 = int_to_ptr.vmem [resolvable:$false] %s787_s26 }
  0x2b   : > { %p1061_p4 = pnand %p665_p1, %p1160_p5  ;;  %s789_s7 = scalar_lea.vmem %s788_s26, 256 }
  0x2c   : > { %p785_p9 = pnand %p783_p6, %p743_p8  ;;  %p790_p0 = scmp.lt.s32.totalorder %s251_s12, %s788_s26 }
  0x2d   : > { %p791_p3 = scmp.lt.s32.totalorder %s789_s7, %s782_s22 }
  0x2e   : > { %p786_p10 = pneg %p785_p9 }
  0x2f   : > { %p792_p13 = por %p791_p3, %p790_p0 }
  0x31   : > { %p793_p12 = pnand %p792_p13, %p786_p10 }
  0x33   : > { %796 = shalt.err (!%p793_p12)
}
  0x34   : > { %675 = dma.hbm_to_vmem [thread:$0]  (!%p1003_p7), %s248_s10, 128, %s251_s12, %s1008_s9  }
  0x35   : > { %p799_p8 = pneg %p1061_p4  ;;  %s808_s28 = scalar_lea.vmem %s1054_s5, 2048 }
  0x36   : > { %p809_p1 = scmp.ne.s32.totalorder %s1054_s5, %s808_s28  ;;  %p816_p5 = scmp.lt.s32.totalorder %s1054_s5, %s1054_s5 }
  0x37   : > { %p817_p11 = scmp.lt.s32.totalorder %s808_s28, %s808_s28 }
  0x38   : > { %p811_p6 = pnand %p809_p1, %p799_p8 }
  0x39   : > { %p818_p3 = por %p817_p11, %p816_p5 }
  0x3a   : > { %p812_p9 = pneg %p811_p6 }
  0x3c   : > { %p819_p13 = pnand %p818_p3, %p812_p9 }
  0x3e   : > { %822 = shalt.err (!%p819_p13)
}
  0x3f   : > { %s916_s8 = smov 128   ;;  %s917_s6 = smov 8  }
  0x40   : > { %668 = dma.hbm_to_vmem [thread:$0]  (!%p1061_p4), %s1155_s1, 2048, %s1054_s5, [#allocation6], %s916_s8, %s916_s8, %s917_s6  }
  0x41   : > { %259 = sbr.rel (%p1045_p2) target bundleno = 370 (0x172), region = 36  ;;  %s261_s9 = sand.u32 (!%p1045_p2), 1, %s1019_s14  }
  0x42   : > { %s263_s10 = sand.u32 (!%p1045_p2), 1, %s895_s16   ;;  %s262_s30 = scalar_lea.sflag (!%p1045_p2), [#allocation3], %s261_s9 }
  0x43   : > { %s1089_s12 = sshll.u32 (!%p1045_p2), %s263_s10, 3  ;;  %p1168_p7 = scmp.ne.s32.totalorder (!%p1045_p2), %s1163_s23, 0 }
  0x44   : > { %s265_s26 = scalar_lea.vmem (!%p1045_p2), [#allocation2], %s1089_s12 }
  0x46   : > { %874 = dma.done.wait (%p1168_p7), %s262_s30, 128  }
  0x47   : > { %876 = vsyncadd (%p1168_p7), %s262_s30, 4294967168  ;;  %p1169_p5 = scmp.eq.s32.totalorder %s1019_s14, 0 }
  0x49   : > { %878 = dma.done.wait (%p1169_p5), [#allocation6], 2048   ;;  %p1170_p11 = pmov %p1169_p5 }
  0x4a   : > { %s278_s29 = scalar_lea.vmem [#allocation7], %s1089_s12 }
  0x4b   : > { %880 = vsyncadd (%p1170_p11), [#allocation6], 4294965248 }
  0x4c   : > { %882 = dma.done.wait (%p1168_p7), %s262_s30, 128  }
  0x4d   : > { %884 = vsyncadd (%p1168_p7), %s262_s30, 4294967168  ;;  %v918_v0 = vmov 0.0   ;;  %vm919_vm0 = vmmov 0   ;;  %v337_v1 = vld [vmem:[#allocation5 + $0x78] sm:$0xff]  ;;  %v336_v2 = vld [vmem:[#allocation5 + $0x70] sm:$0xff]  ;;  %s600_s5 = sshll.u32 %s903_s18, 7 }
  0x4e   : > { %620 = vmatprep.subr.mxu0 %v918_v0  ;;  %652 = vmatprep.mubr.msk.f32.mxu0 %vm919_vm0, %v918_v0  ;;  %v335_v3 = vld [vmem:[#allocation5 + $0x68] sm:$0xff]  ;;  %v334_v4 = vld [vmem:[#allocation5 + $0x60] sm:$0xff]  ;;  %v333_v5 = vld [vmem:[#allocation5 + $0x58] sm:$0xff]  ;;  %s310_s13 = scalar_lea.vmem [#allocation8], %s1089_s12  ;;  %s451_s6 = scalar_lea.hbm %s1158_s4, %s600_s5 }
  0x4f   : > { %621 = vmatpush3.msra.mxu0 %v337_v1  ;;  %v332_v6 = vld [vmem:[#allocation5 + $0x50] sm:$0xff]  ;;  %v331_v7 = vld [vmem:[#allocation5 + $0x48] sm:$0xff]  ;;  %v330_v8 = vld [vmem:[#allocation5 + $0x40] sm:$0xff]  ;;  %s453_s7 = sshll.u32 %s310_s13, 4  ;;  %s439_s11 = scalar_lea.sflag [#allocation4], %s263_s10  ;;  %s454_s7 = int_to_ptr.vmem [resolvable:$true] %s453_s7 }
  0x50   : > { %622 = vmatprep.subr.mxu0 %v918_v0  ;;  %v329_v9 = vld [vmem:[#allocation5 + $0x38] sm:$0xff]  ;;  %v328_v10 = vld [vmem:[#allocation5 + $0x30] sm:$0xff]  ;;  %v327_v11 = vld [vmem:[#allocation5 + $0x28] sm:$0xff]  ;;  %s823_s22 = scalar_lea.vmem %s454_s7, 128  ;;  %p1171_p2 = scmp.ne.s32.totalorder %s1164_s24, 0 }
  0x51   : > { %623 = vmatpush3.msra.mxu0 %v336_v2  ;;  %v326_v12 = vld [vmem:[#allocation5 + $0x20] sm:$0xff]  ;;  %v325_v13 = vld [vmem:[#allocation5 + $0x18] sm:$0xff]  ;;  %v324_v14 = vld [vmem:[#allocation5 + $0x10] sm:$0xff]  ;;  %p824_p12 = scmp.ne.s32.totalorder %s454_s7, %s823_s22  ;;  %s920_s9 = smov [#allocation8]  }
  0x52   : > { %624 = vmatprep.subr.mxu0 %v918_v0  ;;  %v323_v15 = vld [vmem:[#allocation5 + $0x8] sm:$0xff]  ;;  %v322_v16 = vld [vmem:[#allocation5] sm:$0xff]  ;;  %v321_v17 = vld [vmem:[%s265_s26] sm:$0xff]  ;;  %s827_s30 = sshll.u32 %s920_s9, 4  ;;  %s828_s30 = int_to_ptr.vmem [resolvable:$false] %s827_s30 }
  0x53   : > { %625 = vmatpush3.msra.mxu0 %v335_v3  ;;  %v598_v19 = vld [vmem:[%s1156_s2] ss:$0 sm:$0xff]  ;;  %v435_v34 = vld [vmem:[%s278_s29] sm:$0xff]  ;;  %p825_p4 = pnand %p824_p12, %p1171_p2  ;;  %s829_s18 = scalar_lea.vmem %s828_s30, 256 }
  0x54   : > { %626 = vmatprep.subr.mxu0 %v918_v0  ;;  %p830_p0 = scmp.lt.s32.totalorder %s454_s7, %s828_s30  ;;  %p831_p8 = scmp.lt.s32.totalorder %s829_s18, %s823_s22 }
  0x55   : > { %627 = vmatpush3.msra.mxu0 %v334_v4  ;;  %p826_p10 = pneg %p825_p4 }
  0x56   : > { %628 = vmatprep.subr.mxu0 %v918_v0  ;;  %p832_p1 = por %p831_p8, %p830_p0 }
  0x57   : > { %629 = vmatpush3.msra.mxu0 %v333_v5 }
  0x58   : > { %630 = vmatprep.subr.mxu0 %v918_v0  ;;  %p833_p6 = pnand %p832_p1, %p826_p10 }
  0x59   : > { %631 = vmatpush3.msra.mxu0 %v332_v6 }
  0x5a   : > { %632 = vmatprep.subr.mxu0 %v918_v0 }
  0x5b   : > { %633 = vmatpush3.msra.mxu0 %v331_v7 }
  0x5c   : > { %634 = vmatprep.subr.mxu0 %v918_v0 }
  0x5d   : > { %635 = vmatpush3.msra.mxu0 %v330_v8 }
  0x5e   : > { %636 = vmatprep.subr.mxu0 %v918_v0 }
  0x5f   : > { %637 = vmatpush3.msra.mxu0 %v329_v9 }
  0x60   : > { %638 = vmatprep.subr.mxu0 %v918_v0 }
  0x61   : > { %639 = vmatpush3.msra.mxu0 %v328_v10 }
  0x62   : > { %640 = vmatprep.subr.mxu0 %v918_v0 }
  0x63   : > { %641 = vmatpush3.msra.mxu0 %v327_v11 }
  0x64   : > { %642 = vmatprep.subr.mxu0 %v918_v0 }
  0x65   : > { %643 = vmatpush3.msra.mxu0 %v326_v12 }
  0x66   : > { %644 = vmatprep.subr.mxu0 %v918_v0 }
  0x67   : > { %645 = vmatpush3.msra.mxu0 %v325_v13 }
  0x68   : > { %646 = vmatprep.subr.mxu0 %v918_v0 }
  0x69   : > { %647 = vmatpush3.msra.mxu0 %v324_v14 }
  0x6a   : > { %648 = vmatprep.subr.mxu0 %v918_v0 }
  0x6b   : > { %649 = vmatpush3.msra.mxu0 %v323_v15 }
  0x6c   : > { %650 = vmatprep.subr.mxu0 %v918_v0 }
  0x6d   : > { %651 = vmatpush3.msra.mxu0 %v322_v16 }
  0x6e   : > { %653 = vmatmul.mubr.f32.vlgmr.msra.gmra.mxu0 %v321_v17 }
 0x12e   : > { %v404_v18 = vpop.f32.mrf.mxu0 }
 0x12f   : > { %v421_v21 = vadd.f32 %v598_v19, %v404_v18 }
 0x130   : > { %v654_v20 = vpop.f32.mrf.mxu0 }
 0x131   : > { %v422_v22 = vmax.f32 %v421_v21, -30.0 }
 0x133   : > { %v423_v23 = vsub.f32 0.0, %v422_v22 }
 0x135   : > { %v424_v24 = vmul.f32 1.442695, %v423_v23 }
 0x137   : > { %737 = vpow2.f32 %v424_v24 }
 0x144   : > { %v738_v25 = vpop.eup %737 }
 0x145   : > { %v426_v26 = vadd.f32 1.0, %v738_v25 }
 0x147   : > { %739 = vrcp.f32 %v426_v26 }
 0x154   : > { %v740_v27 = vpop.eup %739 }
 0x155   : > { %v428_v28 = vmul.f32 %v740_v27, %v426_v26 }
 0x157   : > { %v429_v29 = vsub.f32 2.0, %v428_v28 }
 0x159   : > { %v430_v30 = vmul.f32 %v740_v27, %v429_v29 }
 0x15b   : > { %v431_v31 = vmul.f32 %v430_v30, %v426_v26 }
 0x15d   : > { %v432_v32 = vsub.f32 2.0, %v431_v31 }
 0x15f   : > { %v433_v33 = vmul.f32 %v432_v32, %v430_v30 }
 0x161   : > { %v434_v35 = vmul.f32 %v433_v33, %v421_v21 }
 0x163   : > { %v436_v36 = vadd.f32 %v435_v34, %v434_v35 }
 0x165   : > { %437 = vst [vmem:[%s310_s13] sm:$0xff] %v436_v36 }
 0x166   : > { %836 = shalt.err (!%p833_p6)
}
 0x167   : > { %s837_s12 = scalar_lea.hbm %s451_s6, 128  ;;  %s841_s29 = scalar_lea.hbm %s1158_s4, 256 }
 0x168   : > { %p838_p9 = scmp.ne.s32.totalorder %s451_s6, %s837_s12  ;;  %p842_p7 = scmp.lt.s32.totalorder %s451_s6, %s1158_s4 }
 0x169   : > { %p843_p5 = scmp.lt.s32.totalorder %s841_s29, %s837_s12 }
 0x16a   : > { %p839_p3 = pnand %p838_p9, %p1171_p2 }
 0x16b   : > { %p844_p11 = por %p843_p5, %p842_p7 }
 0x16c   : > { %p840_p13 = pneg %p839_p3 }
 0x16e   : > { %p845_p12 = pnand %p844_p11, %p840_p13 }
 0x170   : > { %848 = shalt.err (!%p845_p12)
}
 0x171   : > { %663 = dma.vmem_to_hbm [thread:$0]  (%p1171_p2), %s454_s7, 128, %s451_s6, %s439_s11  }
 0x172 PF: > { %s465_s5 = sand.u32 1, %s891_s15   ;;  %p1172_p4 = scmp.ne.s32.totalorder %s1165_s25, 0 }
 0x173   : > { %p1173_p10 = scmp.ge.s32.totalorder %s911_s20, 2  ;;  %s466_s13 = scalar_lea.sflag [#allocation4], %s465_s5 }
 0x175   : > { %p677_p0 = pnand %p1173_p10, %p1172_p4 }
 0x177   : > { %p678_p8 = pneg %p677_p0 }
 0x179   : > { %886 = dma.done.wait (%p678_p8), %s466_s13, 128  }
 0x17a   : > { %888 = vsyncadd (%p678_p8), %s466_s13, 4294967168  ;;  %s21_s20 = sadd.s32 1, %s911_s20   ;;  %s1174_s15 = smov %s895_s16 }
 0x17b   : > { %p18_p1 = scmp.ge.s32.totalorder %s21_s20, 4   ;;  %s1175_s16 = smov %s899_s17 }
 0x17c   : > { %s1176_s17 = smov %s994_s27  ;;  %s1177_s18 = smov %s907_s19 }
 0x17d   : > { %s1178_s19 = smov %s1180_s21  ;;  %20 = sbr.rel (!%p18_p1) target bundleno = 7 (0x7), region = 108 }
 0x182   :  { %471 = vsyncpa [#allocation3], 1 }
 0x183   :  { %473 = vsyncpa [#allocation3 + $0x1], 1 }
 0x184   :  { %474 = vsyncpa [#allocation6], 1 }
 0x185   :  { %475 = vsyncpa [#allocation4], 1 }
 0x186   :  { %477 = vsyncpa [#allocation4 + $0x1], 1 }

</bundles_post_ra>
